<compile_context>
chip_gen: v7x
topology: tpu7x:2x2x1
jax: 0.10.0
libtpu: 0.0.40
codegen_flags: <defaults>
</compile_context>

<pallas_src>
import functools

import jax
import jax.numpy as jnp
from jax.experimental import pallas as pl
from jax.experimental.pallas import tpu as pltpu

LANE = 128


def _round_up(x, m):
    return ((x + m - 1) // m) * m


def _qnetwork_kernel(x_ref, w1_ref, b1_ref, w2_ref, b2_ref, w3_ref, b3_ref,
                     *out_refs, out_dim, compute_dtype, with_q):
    cd = compute_dtype
    # fc1 + relu : MXU in compute dtype (weights already cast), f32 accumulate.
    h1 = jnp.dot(x_ref[...].astype(cd), w1_ref[...],
                 preferred_element_type=jnp.float32)
    h1 = jnp.maximum(h1 + b1_ref[...], 0.0)
    # fc2 + relu
    h2 = jnp.dot(h1.astype(cd), w2_ref[...],
                 preferred_element_type=jnp.float32)
    h2 = jnp.maximum(h2 + b2_ref[...], 0.0)
    # fc3 (output lanes padded to a multiple of 128; padded cols have zero W/b)
    q = jnp.dot(h2.astype(cd), w3_ref[...],
                preferred_element_type=jnp.float32) + b3_ref[...]

    if with_q:
        q_ref, act_ref = out_refs
        q_ref[...] = q.astype(q_ref.dtype)
    else:
        (act_ref,) = out_refs

    # Fused greedy action: argmax over the valid (un-padded) lanes.
    lanes = jax.lax.broadcasted_iota(jnp.int32, q.shape, dimension=1)
    q_masked = jnp.where(lanes < out_dim, q, -jnp.inf)
    q_max = jnp.max(q_masked, axis=-1, keepdims=True)
    idx = jnp.where(q_masked >= q_max, lanes, jnp.int32(out_dim))
    act = jnp.min(idx, axis=-1, keepdims=True)
    act = jnp.minimum(act, out_dim - 1)          # guard: always in-range (NaN rows)
    act_ref[...] = act.astype(jnp.int32)


@functools.partial(jax.jit,
                   static_argnames=("compute_dtype", "q_dtype", "tile_b_max", "with_q"))
def qnetwork_forward(x, params, *, compute_dtype=jnp.bfloat16,
                     q_dtype=jnp.float32, tile_b_max=1024, with_q=True):
    """x: (B, input_dim) float32. params: dict of w1,b1,w2,b2,w3,b3 (weights (in,out)).

    Returns (q_values (B, out_dim) q_dtype or None, greedy_actions (B,) int32)."""
    w1, b1 = params["w1"], params["b1"]
    w2, b2 = params["w2"], params["b2"]
    w3, b3 = params["w3"], params["b3"]

    B, input_dim = x.shape
    hid1 = w1.shape[1]
    hid2 = w2.shape[1]
    out_dim = w3.shape[1]

    # ---- batch tiling -------------------------------------------------------
    # Mem/overhead-bound: use the biggest tile up to tile_b_max. If everything
    # would fit in a single grid step but B is big enough, split into two tiles
    # so v7x's second TensorCore gets work (no effect on v5e/v6e).
    b8 = _round_up(max(B, 1), 8)
    if b8 <= 8:
        tile_b = 8
    else:
        tile_b = min(tile_b_max, _round_up(pl.cdiv(b8, 2), 8))
    n_tiles = pl.cdiv(B, tile_b)   # ragged last block: Pallas masks OOB stores

    # Lane-dense q slab (multiple of 128 lanes) so q stores are unmasked vst.
    out_pad = _round_up(out_dim, LANE)

    # Cast weights to the MXU compute dtype once per call (not per grid step);
    # biases stay f32 for the VPU-side add.
    w1c = w1.astype(compute_dtype)
    w2c = w2.astype(compute_dtype)
    w3c = jnp.pad(w3, ((0, 0), (0, out_pad - out_dim))).astype(compute_dtype)
    b3p = jnp.pad(b3, ((0, 0), (0, out_pad - out_dim)))

    kernel = functools.partial(_qnetwork_kernel, out_dim=out_dim,
                               compute_dtype=compute_dtype, with_q=with_q)

    # Same block index every step -> fetched once, VMEM-resident across the grid.
    resident = lambda shape: pl.BlockSpec(shape, lambda i: (0, 0))

    in_specs = [
        pl.BlockSpec((tile_b, input_dim), lambda i: (i, 0)),   # x tile (pipelined)
        resident((input_dim, hid1)),                           # w1 (compute dtype)
        resident((1, hid1)),                                   # b1 (f32)
        resident((hid1, hid2)),                                # w2 (compute dtype)
        resident((1, hid2)),                                   # b2 (f32)
        resident((hid2, out_pad)),                             # w3 (lane-padded)
        resident((1, out_pad)),                                # b3 (lane-padded, f32)
    ]

    act_shape = jax.ShapeDtypeStruct((B, 1), jnp.int32)
    act_spec = pl.BlockSpec((tile_b, 1), lambda i: (i, 0))
    if with_q:
        out_shape = (jax.ShapeDtypeStruct((B, out_pad), q_dtype), act_shape)
        out_specs = (pl.BlockSpec((tile_b, out_pad), lambda i: (i, 0)), act_spec)
    else:
        out_shape = (act_shape,)
        out_specs = (act_spec,)

    outs = pl.pallas_call(
        kernel,
        out_shape=out_shape,
        grid=(n_tiles,),
        in_specs=in_specs,
        out_specs=out_specs,
        compiler_params=pltpu.CompilerParams(
            dimension_semantics=("parallel",)),                # v7x: shard over 2 TCs
    )(x, w1c, b1, w2c, b2, w3c, b3p)

    if with_q:
        q_pad, act = outs
        return q_pad[:, :out_dim], act[:, 0]
    (act,) = outs
    return None, act[:, 0]


def init_params(key, input_dim, output_dim):
    """Deterministic init matching nn.Linear shapes (stored transposed as (in, out))."""
    k1, k2, k3, k4, k5, k6 = jax.random.split(key, 6)

    def linear(kw, kb, fan_in, fan_out):
        bound = 1.0 / jnp.sqrt(fan_in)
        w = jax.random.uniform(kw, (fan_in, fan_out), jnp.float32, -bound, bound)
        b = jax.random.uniform(kb, (1, fan_out), jnp.float32, -bound, bound)
        return w, b

    w1, b1 = linear(k1, k2, input_dim, 128)
    w2, b2 = linear(k3, k4, 128, 64)
    w3, b3 = linear(k5, k6, 64, output_dim)
    return {"w1": w1, "b1": b1, "w2": w2, "b2": b2, "w3": w3, "b3": b3}


if __name__ == "__main__":
    key = jax.random.PRNGKey(0)
    kx, kp = jax.random.split(key)

    input_dim = 16   # x_train.shape[1] stand-in
    output_dim = 3
    batch = 8

    x = jax.random.normal(kx, (batch, input_dim), jnp.float32)
    params = init_params(kp, input_dim, output_dim)

    q_values, actions = qnetwork_forward(x, params)
    jax.block_until_ready((q_values, actions))

    # Exercise the actions-only fast path (skips the dominant q HBM stream).
    _, actions_only = qnetwork_forward(x, params, with_q=False)
    jax.block_until_ready(actions_only)

    # Reference in plain JAX using the same precision path (bf16 MXU, f32 accumulate).
    cd = jnp.bfloat16
    h1 = jnp.maximum(
        jnp.dot(x.astype(cd), params["w1"].astype(cd),
                preferred_element_type=jnp.float32) + params["b1"], 0.0)
    h2 = jnp.maximum(
        jnp.dot(h1.astype(cd), params["w2"].astype(cd),
                preferred_element_type=jnp.float32) + params["b2"], 0.0)
    q_ref = jnp.dot(h2.astype(cd), params["w3"].astype(cd),
                    preferred_element_type=jnp.float32) + params["b3"]

    assert q_values.shape == (batch, output_dim)
    assert actions.shape == (batch,)
    assert jnp.allclose(q_values, q_ref, atol=2e-2, rtol=2e-2), \
        float(jnp.max(jnp.abs(q_values - q_ref)))
    assert jnp.array_equal(actions, jnp.argmax(q_values, axis=-1))
    assert jnp.array_equal(actions_only, actions)

    print("KERNEL_OK")
</pallas_src>

<mosaic_0001>
module attributes {stable_mosaic.version = 11 : i64} {
  func.func @_qnetwork_kernel(%arg0: i32, %arg1: memref<8x16xf32, #tpu.memory_space<vmem>>, %arg2: memref<16x128xbf16, #tpu.memory_space<vmem>>, %arg3: memref<1x128xf32, #tpu.memory_space<vmem>>, %arg4: memref<128x64xbf16, #tpu.memory_space<vmem>>, %arg5: memref<1x64xf32, #tpu.memory_space<vmem>>, %arg6: memref<64x128xbf16, #tpu.memory_space<vmem>>, %arg7: memref<1x128xf32, #tpu.memory_space<vmem>>, %arg8: memref<8x128xf32, #tpu.memory_space<vmem>>, %arg9: memref<8x1xi32, #tpu.memory_space<vmem>>) attributes {dimension_semantics = [#tpu.dimension_semantics<parallel>], iteration_bounds = array<i64: 1>, scalar_prefetch = 0 : i64, scratch_operands = 0 : i64, tpu.core_type = #tpu.core_type<tc>, window_params = [{transform_indices = @transform_0, window_bounds = array<i64: 8, 16>}, {pipeline_mode = #tpu.pipeline_mode<synchronous>, transform_indices = @transform_1, window_bounds = array<i64: 16, 128>}, {pipeline_mode = #tpu.pipeline_mode<synchronous>, transform_indices = @transform_2, window_bounds = array<i64: 1, 128>}, {pipeline_mode = #tpu.pipeline_mode<synchronous>, transform_indices = @transform_3, window_bounds = array<i64: 128, 64>}, {pipeline_mode = #tpu.pipeline_mode<synchronous>, transform_indices = @transform_4, window_bounds = array<i64: 1, 64>}, {pipeline_mode = #tpu.pipeline_mode<synchronous>, transform_indices = @transform_5, window_bounds = array<i64: 64, 128>}, {pipeline_mode = #tpu.pipeline_mode<synchronous>, transform_indices = @transform_6, window_bounds = array<i64: 1, 128>}, {transform_indices = @transform_7, window_bounds = array<i64: 8, 128>}, {transform_indices = @transform_8, window_bounds = array<i64: 8, 1>}]} {
    %c0 = arith.constant 0 : index
    %c0_0 = arith.constant 0 : index
    %0 = vector.load %arg1[%c0, %c0_0] : memref<8x16xf32, #tpu.memory_space<vmem>>, vector<8x16xf32>
    %1 = arith.truncf %0 : vector<8x16xf32> to vector<8x16xbf16>
    %c0_1 = arith.constant 0 : index
    %c0_2 = arith.constant 0 : index
    %2 = vector.load %arg2[%c0_1, %c0_2] : memref<16x128xbf16, #tpu.memory_space<vmem>>, vector<16x128xbf16>
    %cst = arith.constant dense<0.000000e+00> : vector<8x128xf32>
    %3 = tpu.matmul %1, %2, %cst {dimension_numbers = #tpu.dot_dimension_numbers<[1], [0], [0], [1], [0, 0, 1, 1], [], []>} : vector<8x16xbf16>, vector<16x128xbf16>, vector<8x128xf32> -> vector<8x128xf32>
    %c0_3 = arith.constant 0 : index
    %c0_4 = arith.constant 0 : index
    %4 = vector.load %arg3[%c0_3, %c0_4] : memref<1x128xf32, #tpu.memory_space<vmem>>, vector<1x128xf32>
    %5 = vector.broadcast %4 : vector<1x128xf32> to vector<8x128xf32>
    %6 = arith.addf %3, %5 : vector<8x128xf32>
    %cst_5 = arith.constant 0.000000e+00 : f32
    %7 = vector.broadcast %cst_5 : f32 to vector<8x128xf32>
    %8 = arith.maximumf %6, %7 : vector<8x128xf32>
    %9 = arith.truncf %8 : vector<8x128xf32> to vector<8x128xbf16>
    %c0_6 = arith.constant 0 : index
    %c0_7 = arith.constant 0 : index
    %10 = vector.load %arg4[%c0_6, %c0_7] : memref<128x64xbf16, #tpu.memory_space<vmem>>, vector<128x64xbf16>
    %cst_8 = arith.constant dense<0.000000e+00> : vector<8x64xf32>
    %11 = tpu.matmul %9, %10, %cst_8 {dimension_numbers = #tpu.dot_dimension_numbers<[1], [0], [0], [1], [0, 0, 1, 1], [], []>} : vector<8x128xbf16>, vector<128x64xbf16>, vector<8x64xf32> -> vector<8x64xf32>
    %c0_9 = arith.constant 0 : index
    %c0_10 = arith.constant 0 : index
    %12 = vector.load %arg5[%c0_9, %c0_10] : memref<1x64xf32, #tpu.memory_space<vmem>>, vector<1x64xf32>
    %13 = vector.broadcast %12 : vector<1x64xf32> to vector<8x64xf32>
    %14 = arith.addf %11, %13 : vector<8x64xf32>
    %cst_11 = arith.constant 0.000000e+00 : f32
    %15 = vector.broadcast %cst_11 : f32 to vector<8x64xf32>
    %16 = arith.maximumf %14, %15 : vector<8x64xf32>
    %17 = arith.truncf %16 : vector<8x64xf32> to vector<8x64xbf16>
    %c0_12 = arith.constant 0 : index
    %c0_13 = arith.constant 0 : index
    %18 = vector.load %arg6[%c0_12, %c0_13] : memref<64x128xbf16, #tpu.memory_space<vmem>>, vector<64x128xbf16>
    %cst_14 = arith.constant dense<0.000000e+00> : vector<8x128xf32>
    %19 = tpu.matmul %17, %18, %cst_14 {dimension_numbers = #tpu.dot_dimension_numbers<[1], [0], [0], [1], [0, 0, 1, 1], [], []>} : vector<8x64xbf16>, vector<64x128xbf16>, vector<8x128xf32> -> vector<8x128xf32>
    %c0_15 = arith.constant 0 : index
    %c0_16 = arith.constant 0 : index
    %20 = vector.load %arg7[%c0_15, %c0_16] : memref<1x128xf32, #tpu.memory_space<vmem>>, vector<1x128xf32>
    %21 = vector.broadcast %20 : vector<1x128xf32> to vector<8x128xf32>
    %22 = arith.addf %19, %21 : vector<8x128xf32>
    %c0_17 = arith.constant 0 : index
    %c0_18 = arith.constant 0 : index
    %23 = vector.load %arg8[%c0_17, %c0_18] : memref<8x128xf32, #tpu.memory_space<vmem>>, vector<8x128xf32>
    tpu.vector_store %arg8[%c0_17, %c0_18], %22 {strides = array<i32>} : memref<8x128xf32, #tpu.memory_space<vmem>>, vector<8x128xf32>,
    %24 = tpu.iota {dimensions = array<i32: 1>} : vector<8x128xi32>
    %c3_i32 = arith.constant 3 : i32
    %25 = vector.broadcast %c3_i32 : i32 to vector<8x128xi32>
    %26 = arith.cmpi slt, %24, %25 : vector<8x128xi32>
    %cst_19 = arith.constant 0xFF800000 : f32
    %27 = vector.broadcast %cst_19 : f32 to vector<8x128xf32>
    %28 = arith.select %26, %22, %27 : vector<8x128xi1>, vector<8x128xf32>
    %cst_20 = arith.constant dense<0xFF800000> : vector<8xf32>
    %29 = vector.multi_reduction <maximumf>, %28, %cst_20 [1] : vector<8x128xf32> to vector<8xf32>
    %30 = vector.shape_cast %29 : vector<8xf32> to vector<8x1xf32>
    %31 = vector.broadcast %30 : vector<8x1xf32> to vector<8x128xf32>
    %32 = arith.cmpf oge, %28, %31 : vector<8x128xf32>
    %c3_i32_21 = arith.constant 3 : i32
    %33 = vector.broadcast %c3_i32_21 : i32 to vector<8x128xi32>
    %34 = arith.select %32, %24, %33 : vector<8x128xi1>, vector<8x128xi32>
    %cst_22 = arith.constant dense<2147483647> : vector<8xi32>
    %35 = vector.multi_reduction <minsi>, %34, %cst_22 [1] : vector<8x128xi32> to vector<8xi32>
    %36 = vector.shape_cast %35 : vector<8xi32> to vector<8x1xi32>
    %c2_i32 = arith.constant 2 : i32
    %37 = vector.broadcast %c2_i32 : i32 to vector<8x1xi32>
    %38 = arith.minsi %36, %37 : vector<8x1xi32>
    %c0_23 = arith.constant 0 : index
    %c0_24 = arith.constant 0 : index
    %39 = vector.load %arg9[%c0_23, %c0_24] : memref<8x1xi32, #tpu.memory_space<vmem>>, vector<8x1xi32>
    tpu.vector_store %arg9[%c0_23, %c0_24], %38 {strides = array<i32>} : memref<8x1xi32, #tpu.memory_space<vmem>>, vector<8x1xi32>,
    return
  }
  func.func @transform_0(%arg0: i32) -> (i32, i32) {
    %c0_i32 = arith.constant 0 : i32
    %c0_i32_0 = arith.constant 0 : i32
    return %arg0, %c0_i32 : i32, i32
  }
  func.func @transform_1(%arg0: i32) -> (i32, i32) {
    %c0_i32 = arith.constant 0 : i32
    %c0_i32_0 = arith.constant 0 : i32
    %c0_i32_1 = arith.constant 0 : i32
    return %c0_i32, %c0_i32_0 : i32, i32
  }
  func.func @transform_2(%arg0: i32) -> (i32, i32) {
    %c0_i32 = arith.constant 0 : i32
    %c0_i32_0 = arith.constant 0 : i32
    %c0_i32_1 = arith.constant 0 : i32
    return %c0_i32, %c0_i32_0 : i32, i32
  }
  func.func @transform_3(%arg0: i32) -> (i32, i32) {
    %c0_i32 = arith.constant 0 : i32
    %c0_i32_0 = arith.constant 0 : i32
    %c0_i32_1 = arith.constant 0 : i32
    return %c0_i32, %c0_i32_0 : i32, i32
  }
  func.func @transform_4(%arg0: i32) -> (i32, i32) {
    %c0_i32 = arith.constant 0 : i32
    %c0_i32_0 = arith.constant 0 : i32
    %c0_i32_1 = arith.constant 0 : i32
    return %c0_i32, %c0_i32_0 : i32, i32
  }
  func.func @transform_5(%arg0: i32) -> (i32, i32) {
    %c0_i32 = arith.constant 0 : i32
    %c0_i32_0 = arith.constant 0 : i32
    %c0_i32_1 = arith.constant 0 : i32
    return %c0_i32, %c0_i32_0 : i32, i32
  }
  func.func @transform_6(%arg0: i32) -> (i32, i32) {
    %c0_i32 = arith.constant 0 : i32
    %c0_i32_0 = arith.constant 0 : i32
    %c0_i32_1 = arith.constant 0 : i32
    return %c0_i32, %c0_i32_0 : i32, i32
  }
  func.func @transform_7(%arg0: i32) -> (i32, i32) {
    %c0_i32 = arith.constant 0 : i32
    %c0_i32_0 = arith.constant 0 : i32
    return %arg0, %c0_i32 : i32, i32
  }
  func.func @transform_8(%arg0: i32) -> (i32, i32) {
    %c0_i32 = arith.constant 0 : i32
    %c0_i32_0 = arith.constant 0 : i32
    return %arg0, %c0_i32 : i32, i32
  }
}

</mosaic_0001>

<bundles_post_ra>
// kernel: qnetwork_forward.1
= control target key start
LH: loop header
LB: loop body
LE: loop exit
PB: predicated region body
PF: predicated region fallthrough
CT: control target
= control target key end

     0   :  { %v410_v0 = vmov 0.0   ;;  %vm411_vm0 = vmmov 0   ;;  %vm46_vm1 = vcmask 130048   ;;  %vm244_vm2 = vcmask 523264   ;;  %s514_s1 = inlined_call_operand.vmem [shape: bf16[16,128], index: 1, kind: input, shape index: {}]   ;;  %s515_s0 = inlined_call_operand.vmem [shape: f32[8,16], index: 0, kind: input, shape index: {}]   ;;  %s516_s3 = inlined_call_operand.vmem [shape: bf16[128,64], index: 3, kind: input, shape index: {}]   ;;  %s517_s5 = inlined_call_operand.vmem [shape: bf16[64,128], index: 5, kind: input, shape index: {}]   ;;  %s518_s2 = inlined_call_operand.vmem [shape: f32[1,128], index: 2, kind: input, shape index: {}]   ;;  %s519_s4 = inlined_call_operand.vmem [shape: f32[1,64], index: 4, kind: input, shape index: {}]   ;;  %s520_s6 = inlined_call_operand.vmem [shape: f32[1,128], index: 6, kind: input, shape index: {}]   ;;  %s521_s7 = inlined_call_operand.vmem [shape: f32[8,128], index: 7, kind: output, shape index: {0}]   ;;  %s522_s8 = inlined_call_operand.vmem [shape: s32[8,1], index: 8, kind: output, shape index: {1}]  }
   0x1   :  { %357 = vmatprep.subr.bf16.mxu0 %v410_v0  ;;  %v397_v1 = vld [vmem:[%s514_s1] sm:$0xff]   ;;  %359 = vmatprep.mubr.msk.bf16.mxu0 %vm411_vm0, %v410_v0  ;;  %v399_v5 = vld [vmem:[%s516_s3 + $0x8] sm:$0xff]   ;;  %v400_v6 = vld [vmem:[%s516_s3 + $0x10] sm:$0xff]   ;;  %v289_v32 = vlaneseq  ;;  %vm313_vm6 = vcmask 7168  }
   0x2   :  { %v29_v2 = vld [vmem:[%s515_s0] sm:$0xff]  ;;  %363 = vmatprep.subr.bf16.mxu1 %v410_v0  ;;  %379 = vmatprep.mubr.msk.bf16.mxu1 %vm411_vm0, %v410_v0  ;;  %v401_v7 = vld [vmem:[%s516_s3 + $0x18] sm:$0xff]   ;;  %v403_v9 = vld [vmem:[%s516_s3 + $0x28] sm:$0xff]  }
   0x3   :  { %358 = vmatpush3.bf16.msra.mxu0 %v397_v1  ;;  %v30_v3 = vpack.c.bf16 %v29_v2, %v29_v2  ;;  %v398_v4 = vld [vmem:[%s516_s3] sm:$0xff]   ;;  %v404_v10 = vld [vmem:[%s516_s3 + $0x30] sm:$0xff]   ;;  %v405_v11 = vld [vmem:[%s516_s3 + $0x38] sm:$0xff]   ;;  %v290_v33 = vand.u32 127, %v289_v32 }
   0x4   :  { %383 = vmatprep.subr.bf16.mxu0 %v410_v0  ;;  %364 = vmatpush3.bf16.msra.mxu1 %v398_v4  ;;  %v402_v8 = vld [vmem:[%s516_s3 + $0x20] sm:$0xff]   ;;  %v407_v13 = vld [vmem:[%s517_s5 + $0x8] sm:$0xff]   ;;  %v408_v22 = vld [vmem:[%s517_s5 + $0x10] sm:$0xff]  }
   0x5   :  { %365 = vmatprep.subr.bf16.mxu1 %v410_v0  ;;  %v406_v12 = vld [vmem:[%s517_s5] sm:$0xff]   ;;  %v409_v23 = vld [vmem:[%s517_s5 + $0x18] sm:$0xff]   ;;  %vm291_vm3 = vcmp.lt.s32.totalorder %v290_v33, 3 }
   0x6   :  { %360 = vmatmul.mubr.msk.bf16.vlgmr.msra.gmra.mrb[0].mxu0 %vm46_vm1, %v30_v3  ;;  %v323_v14 = vld [vmem:[%s518_s2] ss:$0 sm:$0xff] }
   0x7   :  { %391 = vmatprep.mubr.msk.bf16.mxu0 %vm411_vm0, %v410_v0  ;;  %384 = vmatpush3.bf16.msra.mxu0 %v406_v12  ;;  %v326_v24 = vld [vmem:[%s519_s4] ss:$0 sm:$0xff] }
   0x8   :  { %366 = vmatpush3.bf16.msra.mxu1 %v399_v5  ;;  %385 = vmatprep.subr.bf16.mxu0 %v410_v0  ;;  %v335_v34 = vld [vmem:[%s520_s6] ss:$0 sm:$0xff] }
   0x9   :  { %367 = vmatprep.subr.bf16.mxu1 %v410_v0 }
   0xb   :  { %386 = vmatpush3.bf16.msra.mxu0 %v407_v13 }
   0xc   :  { %368 = vmatpush3.bf16.msra.mxu1 %v400_v6  ;;  %387 = vmatprep.subr.bf16.mxu0 %v410_v0 }
   0xd   :  { %369 = vmatprep.subr.bf16.mxu1 %v410_v0 }
   0xf   :  { %388 = vmatpush3.bf16.msra.mxu0 %v408_v22 }
  0x10   :  { %370 = vmatpush3.bf16.msra.mxu1 %v401_v7  ;;  %389 = vmatprep.subr.bf16.mxu0 %v410_v0 }
  0x11   :  { %371 = vmatprep.subr.bf16.mxu1 %v410_v0 }
  0x13   :  { %390 = vmatpush3.bf16.msra.mxu0 %v409_v23 }
  0x14   :  { %372 = vmatpush3.bf16.msra.mxu1 %v402_v8 }
  0x15   :  { %373 = vmatprep.subr.bf16.mxu1 %v410_v0 }
  0x18   :  { %374 = vmatpush3.bf16.msra.mxu1 %v403_v9 }
  0x19   :  { %375 = vmatprep.subr.bf16.mxu1 %v410_v0 }
  0x1c   :  { %376 = vmatpush3.bf16.msra.mxu1 %v404_v10 }
  0x1d   :  { %377 = vmatprep.subr.bf16.mxu1 %v410_v0 }
  0x20   :  { %378 = vmatpush3.bf16.msra.mxu1 %v405_v11 }
  0xd9   :  { %v84_v15 = vpop.f32.mrb[0].mxu0 }
  0xda   :  { %v85_v16 = vadd.f32 %v323_v14, %v84_v15  ;;  %v361_v17 = vpop.f32.mrb[1].mxu0 }
  0xdb   :  { %v87_v18 = vpop.f32.mrb[2].mxu0 }
  0xdc   :  { %v90_v19 = vmax.f32 %v85_v16, 0.0  ;;  %v362_v20 = vpop.f32.mrb[3].mxu0 }
  0xde   :  { %v91_v21 = vpack.c.bf16 %v90_v19, %v90_v19 }
  0xe0   :  { %380 = vmatmul.mubr.bf16.vlgmr.msra.gmra.mrb[0].mxu1 %v91_v21 }
 0x1b3   :  { %v197_v25 = vpop.f32.mrb[0].mxu1 }
 0x1b4   :  { %v198_v26 = vadd.f32 %v326_v24, %v197_v25  ;;  %v381_v27 = vpop.f32.mrb[1].mxu1 }
 0x1b5   :  { %v200_v28 = vpop.f32.mrb[2].mxu1 }
 0x1b6   :  { %v203_v29 = vmax.f32 %v198_v26, 0.0  ;;  %v382_v30 = vpop.f32.mrb[3].mxu1 }
 0x1b8   :  { %v204_v31 = vpack.c.bf16 %v203_v29, %v203_v29 }
 0x1ba   :  { %392 = vmatmul.mubr.msk.bf16.vlgmr.msra.gmra.mrb[4].mxu0 %vm244_vm2, %v204_v31 }
 0x28d   :  { %v282_v35 = vpop.f32.mrb[4].mxu0 }
 0x28e   :  { %v283_v36 = vadd.f32 %v335_v34, %v282_v35  ;;  %v393_v37 = vpop.f32.mrb[5].mxu0 }
 0x28f   :  { %v285_v38 = vpop.f32.mrb[6].mxu0 }
 0x290   :  { %288 = vst [vmem:[%s521_s7] sm:$0xff] %v283_v36  ;;  %v394_v39 = vpop.f32.mrb[7].mxu0  ;;  %v292_v40 = vsel %vm291_vm3, %v283_v36, -inf }
 0x291   :  { %293 = vmax.xlane.f32.xlu0 %v292_v40 }
 0x31e   :  { %v294_v41 = vpop.xlane.xlu0 %293 }
 0x31f   :  { %vm295_vm4 = vcmp.ge.f32.partialorder %v292_v40, %v294_v41 }
 0x320   :  { %v296_v42 = vsel %vm295_vm4, %v290_v33, 3 }
 0x321   :  { %v298_v43 = vshra.s32 %v296_v42, 16  ;;  %v297_v45 = vand.u32 65535, %v296_v42 }
 0x323   :  { %v300_v44 = vcvt.s32.f32 %v298_v43  ;;  %v299_v47 = vcvt.s32.f32 %v297_v45 }
 0x325   :  { %301 = vmin.xlane.f32.xlu0 %v300_v44 }
 0x3b2   :  { %v302_v46 = vpop.xlane.xlu0 %301 }
 0x3b3   :  { %vm303_vm5 = vcmp.eq.f32.partialorder %v300_v44, %v302_v46  ;;  %v308_v49 = vcvt.f32.s32 %v302_v46 }
 0x3b4   :  { %v304_v48 = vsel %vm303_vm5, %v299_v47, inf }
 0x3b5   :  { %305 = vmin.xlane.f32.xlu1 %v304_v48  ;;  %v309_v51 = vshll.u32 %v308_v49, 16 }
 0x442   :  { %v306_v50 = vpop.xlane.xlu1 %305 }
 0x443   :  { %v307_v52 = vcvt.f32.s32 %v306_v50 }
 0x445   :  { %v310_v53 = vadd.s32 %v309_v51, %v307_v52 }
 0x447   :  { %vm311_vm7 = vcmp.lt.s32.totalorder %v310_v53, 2 }
 0x448   :  { %v312_v54 = vsel %vm311_vm7, %v310_v53, 2 }
 0x449   :  { %314 = vst.msk [vmem:[%s522_s8] sm:$0xff] %vm313_vm6, %v312_v54 }

</bundles_post_ra>
